<compile_context>
chip_gen: v5e
topology: v5e:2x2
jax: 0.10.0
libtpu: 0.0.40
codegen_flags: <defaults>
</compile_context>

<pallas_src>
import functools

import jax
import jax.numpy as jnp
from jax.experimental import pallas as pl
from jax.experimental.pallas import tpu as pltpu


def _round_up(v, m):
    return ((v + m - 1) // m) * m


def _trip_center_kernel(scalars_ref, x_ref, csq_ref, labels_ref, other_ref,
                        centers_ref, out_ref, *, actual_batch):
    margin = scalars_ref[0]
    w = scalars_ref[1]

    x = x_ref[...]            # (TB, D), native dtype (f32 or bf16)
    c = centers_ref[...]      # (C, D), native dtype

    tb = x.shape[0]
    num_classes = c.shape[0]

    # ||x||^2 per row, computed in f32 on the VPU.
    xf = x.astype(jnp.float32)
    x_sq = jnp.sum(xf * xf, axis=1, keepdims=True)               # (TB, 1)

    # MXU matmul with trans-B contraction (no explicit centers.T relayout),
    # f32 accumulation regardless of operand dtype.
    xc = jax.lax.dot_general(
        x, c,
        dimension_numbers=(((1,), (1,)), ((), ())),
        preferred_element_type=jnp.float32)                      # (TB, C)

    # distmat = ||x||^2 + ||c||^2 - 2 x @ c^T  (matches torch addmm_(1, -2, ...))
    distmat = x_sq + csq_ref[...] - 2.0 * xc                     # (TB, C)

    classes = jax.lax.broadcasted_iota(jnp.int32, (tb, num_classes), 1)
    mask = labels_ref[...] == classes                            # (TB, C)
    mask_other = other_ref[...] == classes                       # (TB, C)

    # Fused masked row-reduction: one (TB, C) -> (TB, 1) XLU reduction instead of two.
    combined = jnp.where(mask, w * distmat, 0.0) - jnp.where(
        mask_other, (1.0 - w) * distmat, 0.0)
    signed = jnp.sum(combined, axis=1, keepdims=True)            # (TB, 1)
    hinge = jnp.maximum(margin + signed, 0.0)

    # Zero out rows that are only present because of batch padding.
    row = pl.program_id(0) * tb + jax.lax.broadcasted_iota(jnp.int32, (tb, 1), 0)
    hinge = jnp.where(row < actual_batch, hinge, 0.0)

    out_ref[0, 0] = jnp.sum(hinge)


def trip_center_loss_margin(x, labels, margin, incenter_weight, centers, key,
                            block_batch=256):
    """Pallas implementation of TripCenterLoss_margin.forward.

    x:       (batch, feat_dim) float32 or bfloat16
    labels:  (batch,) int32 in [0, num_classes)
    centers: (num_classes, feat_dim) parameter
    key:     PRNG key for the Other_label random offsets.
    """
    num_classes, feat_dim = centers.shape
    batch = x.shape[0]

    # Other_label: other = labels + randint(num_classes); wrap modulo num_classes.
    # TODO(synk): torch draws offsets in [0, num_classes), so other_label can equal
    # label; semantics preserved here.
    idx = jax.random.randint(key, (batch,), 0, num_classes, dtype=jnp.int32)
    other_labels = (labels.astype(jnp.int32) + idx) % num_classes

    # Batch tile: multiple of 8 sublanes, capped so double-buffered tiles fit
    # comfortably even in v7x's smaller VMEM.
    tb = min(block_batch, _round_up(batch, 8))
    padded = _round_up(batch, tb)
    num_tiles = padded // tb

    labels2 = labels.astype(jnp.int32).reshape(batch, 1)
    other2 = other_labels.reshape(batch, 1)
    if padded != batch:
        pad = padded - batch
        x = jnp.pad(x, ((0, pad), (0, 0)))
        labels2 = jnp.pad(labels2, ((0, pad), (0, 0)))
        other2 = jnp.pad(other2, ((0, pad), (0, 0)))

    scalars = jnp.array([margin, incenter_weight], dtype=jnp.float32)
    # Per-class squared norms are constant across batch tiles -> hoist to wrapper.
    c_sq = jnp.sum(centers.astype(jnp.float32) ** 2, axis=1).reshape(1, num_classes)

    itemsize = jnp.dtype(x.dtype).itemsize
    c_itemsize = jnp.dtype(centers.dtype).itemsize
    # Rough VMEM footprint: double-buffered x/label tiles + resident centers/c_sq
    # + (TB, C) intermediates (lane-padded to 128).
    vmem_est = (2 * tb * feat_dim * itemsize
                + 2 * 2 * tb * 4
                + num_classes * feat_dim * c_itemsize
                + max(num_classes, 128) * 4
                + 4 * tb * max(num_classes, 128) * 4)
    vmem_limit = int(2 * vmem_est) if 2 * vmem_est > (32 << 20) else None

    cost = pl.CostEstimate(
        flops=2 * padded * num_classes * feat_dim + 8 * padded * num_classes,
        transcendentals=0,
        bytes_accessed=(padded * feat_dim * itemsize
                        + num_classes * feat_dim * c_itemsize
                        + 2 * padded * 4
                        + num_tiles * 4),
    )

    partials = pl.pallas_call(
        functools.partial(_trip_center_kernel, actual_batch=batch),
        out_shape=jax.ShapeDtypeStruct((num_tiles, 1), jnp.float32),
        grid_spec=pltpu.PrefetchScalarGridSpec(
            num_scalar_prefetch=0,
            grid=(num_tiles,),
            in_specs=[
                pl.BlockSpec(memory_space=pltpu.MemorySpace.SMEM),        # [margin, w]
                pl.BlockSpec((tb, feat_dim), lambda i: (i, 0)),           # x tile
                pl.BlockSpec((1, num_classes), lambda i: (0, 0)),         # c_sq (pinned)
                pl.BlockSpec((tb, 1), lambda i: (i, 0)),                  # labels tile
                pl.BlockSpec((tb, 1), lambda i: (i, 0)),                  # other-labels tile
                pl.BlockSpec((num_classes, feat_dim), lambda i: (0, 0)),  # centers (pinned)
            ],
            out_specs=pl.BlockSpec((1, 1), lambda i: (i, 0),
                                   memory_space=pltpu.MemorySpace.SMEM),
        ),
        compiler_params=pltpu.CompilerParams(
            dimension_semantics=("parallel",),
            vmem_limit_bytes=vmem_limit,
        ),
        cost_estimate=cost,
    )(scalars, x, c_sq, labels2, other2, centers)

    return jnp.sum(partials) / batch


def _reference(x, labels, other_labels, margin, w, centers):
    distmat = (
        jnp.sum(x**2, axis=1, keepdims=True)
        + jnp.sum(centers**2, axis=1)[None, :]
        - 2.0 * x @ centers.T
    )
    b = x.shape[0]
    dist = distmat[jnp.arange(b), labels]
    dist_other = distmat[jnp.arange(b), other_labels]
    return jnp.sum(jnp.maximum(margin + w * dist - (1 - w) * dist_other, 0.0)) / b


if __name__ == "__main__":
    num_classes = 10
    feat_dim = 32
    batch = 8

    key = jax.random.PRNGKey(0)
    k_x, k_lbl, k_ctr, k_other = jax.random.split(key, 4)

    x = jax.random.normal(k_x, (batch, feat_dim), dtype=jnp.float32)
    labels = jax.random.randint(k_lbl, (batch,), 0, num_classes, dtype=jnp.int32)
    # centers parameter: torch.randn(num_classes, feat_dim) -> deterministic normal init
    centers = jax.random.normal(k_ctr, (num_classes, feat_dim), dtype=jnp.float32)

    margin = 0.5
    incenter_weight = 0.6

    loss = trip_center_loss_margin(x, labels, margin, incenter_weight, centers, k_other)
    loss = jax.block_until_ready(loss)

    # sanity check against a pure-JAX reference with identical other_labels
    idx = jax.random.randint(k_other, (batch,), 0, num_classes, dtype=jnp.int32)
    other_labels = (labels + idx) % num_classes
    ref = _reference(x, labels, other_labels, margin, incenter_weight, centers)
    assert jnp.allclose(loss, ref, rtol=1e-5, atol=1e-5), (loss, ref)

    print("KERNEL_OK")
</pallas_src>

<mosaic_0001>
module attributes {stable_mosaic.version = 11 : i64} {
  func.func @_trip_center_kernel(%arg0: i32, %arg1: memref<2xf32, #tpu.memory_space<smem>>, %arg2: memref<8x32xf32, #tpu.memory_space<vmem>>, %arg3: memref<1x10xf32, #tpu.memory_space<vmem>>, %arg4: memref<8x1xi32, #tpu.memory_space<vmem>>, %arg5: memref<8x1xi32, #tpu.memory_space<vmem>>, %arg6: memref<10x32xf32, #tpu.memory_space<vmem>>, %arg7: memref<1x1xf32, #tpu.memory_space<smem>>) attributes {dimension_semantics = [#tpu.dimension_semantics<parallel>], iteration_bounds = array<i64: 1>, scalar_prefetch = 0 : i64, scratch_operands = 0 : i64, tpu.core_type = #tpu.core_type<tc>, window_params = [{transform_indices = @transform_0, window_bounds = array<i64: 2>}, {transform_indices = @transform_1, window_bounds = array<i64: 8, 32>}, {pipeline_mode = #tpu.pipeline_mode<synchronous>, transform_indices = @transform_2, window_bounds = array<i64: 1, 10>}, {transform_indices = @transform_3, window_bounds = array<i64: 8, 1>}, {transform_indices = @transform_4, window_bounds = array<i64: 8, 1>}, {pipeline_mode = #tpu.pipeline_mode<synchronous>, transform_indices = @transform_5, window_bounds = array<i64: 10, 32>}, {transform_indices = @transform_6, window_bounds = array<i64: 1, 1>}]} {
    %c0 = arith.constant 0 : index
    %0 = memref.load %arg1[%c0] : memref<2xf32, #tpu.memory_space<smem>>
    %c1 = arith.constant 1 : index
    %1 = memref.load %arg1[%c1] : memref<2xf32, #tpu.memory_space<smem>>
    %c0_0 = arith.constant 0 : index
    %c0_1 = arith.constant 0 : index
    %2 = vector.load %arg2[%c0_0, %c0_1] : memref<8x32xf32, #tpu.memory_space<vmem>>, vector<8x32xf32>
    %c0_2 = arith.constant 0 : index
    %c0_3 = arith.constant 0 : index
    %3 = vector.load %arg6[%c0_2, %c0_3] : memref<10x32xf32, #tpu.memory_space<vmem>>, vector<10x32xf32>
    %4 = arith.mulf %2, %2 : vector<8x32xf32>
    %cst = arith.constant dense<0.000000e+00> : vector<8xf32>
    %5 = vector.multi_reduction <add>, %4, %cst [1] : vector<8x32xf32> to vector<8xf32>
    %6 = vector.shape_cast %5 : vector<8xf32> to vector<8x1xf32>
    %cst_4 = arith.constant dense<0.000000e+00> : vector<8x10xf32>
    %7 = tpu.matmul %2, %3, %cst_4 {dimension_numbers = #tpu.dot_dimension_numbers<[1], [1], [0], [0], [0, 0, 1, 0], [], []>} : vector<8x32xf32>, vector<10x32xf32>, vector<8x10xf32> -> vector<8x10xf32>
    %c0_5 = arith.constant 0 : index
    %c0_6 = arith.constant 0 : index
    %8 = vector.load %arg3[%c0_5, %c0_6] : memref<1x10xf32, #tpu.memory_space<vmem>>, vector<1x10xf32>
    %9 = vector.broadcast %6 : vector<8x1xf32> to vector<8x10xf32>
    %10 = vector.broadcast %8 : vector<1x10xf32> to vector<8x10xf32>
    %11 = arith.addf %9, %10 : vector<8x10xf32>
    %cst_7 = arith.constant 2.000000e+00 : f32
    %12 = vector.broadcast %cst_7 : f32 to vector<8x10xf32>
    %13 = arith.mulf %12, %7 : vector<8x10xf32>
    %14 = arith.subf %11, %13 : vector<8x10xf32>
    %15 = tpu.iota {dimensions = array<i32: 1>} : vector<8x10xi32>
    %c0_8 = arith.constant 0 : index
    %c0_9 = arith.constant 0 : index
    %16 = vector.load %arg4[%c0_8, %c0_9] : memref<8x1xi32, #tpu.memory_space<vmem>>, vector<8x1xi32>
    %17 = vector.broadcast %16 : vector<8x1xi32> to vector<8x10xi32>
    %18 = arith.cmpi eq, %17, %15 : vector<8x10xi32>
    %c0_10 = arith.constant 0 : index
    %c0_11 = arith.constant 0 : index
    %19 = vector.load %arg5[%c0_10, %c0_11] : memref<8x1xi32, #tpu.memory_space<vmem>>, vector<8x1xi32>
    %20 = vector.broadcast %19 : vector<8x1xi32> to vector<8x10xi32>
    %21 = arith.cmpi eq, %20, %15 : vector<8x10xi32>
    %22 = vector.broadcast %1 : f32 to vector<8x10xf32>
    %23 = arith.mulf %22, %14 : vector<8x10xf32>
    %cst_12 = arith.constant 0.000000e+00 : f32
    %24 = vector.broadcast %cst_12 : f32 to vector<8x10xf32>
    %25 = arith.select %18, %23, %24 : vector<8x10xi1>, vector<8x10xf32>
    %cst_13 = arith.constant 1.000000e+00 : f32
    %26 = arith.subf %cst_13, %1 : f32
    %27 = vector.broadcast %26 : f32 to vector<8x10xf32>
    %28 = arith.mulf %27, %14 : vector<8x10xf32>
    %cst_14 = arith.constant 0.000000e+00 : f32
    %29 = vector.broadcast %cst_14 : f32 to vector<8x10xf32>
    %30 = arith.select %21, %28, %29 : vector<8x10xi1>, vector<8x10xf32>
    %31 = arith.subf %25, %30 : vector<8x10xf32>
    %cst_15 = arith.constant dense<0.000000e+00> : vector<8xf32>
    %32 = vector.multi_reduction <add>, %31, %cst_15 [1] : vector<8x10xf32> to vector<8xf32>
    %33 = vector.shape_cast %32 : vector<8xf32> to vector<8x1xf32>
    %34 = vector.broadcast %0 : f32 to vector<8x1xf32>
    %35 = arith.addf %34, %33 : vector<8x1xf32>
    %cst_16 = arith.constant 0.000000e+00 : f32
    %36 = vector.broadcast %cst_16 : f32 to vector<8x1xf32>
    %37 = arith.maximumf %35, %36 : vector<8x1xf32>
    %c8_i32 = arith.constant 8 : i32
    %38 = arith.muli %arg0, %c8_i32 : i32
    %39 = tpu.iota {dimensions = array<i32: 0>} : vector<8x1xi32>
    %40 = vector.broadcast %38 : i32 to vector<8x1xi32>
    %41 = arith.addi %40, %39 : vector<8x1xi32>
    %c8_i32_17 = arith.constant 8 : i32
    %42 = vector.broadcast %c8_i32_17 : i32 to vector<8x1xi32>
    %43 = arith.cmpi slt, %41, %42 : vector<8x1xi32>
    %cst_18 = arith.constant 0.000000e+00 : f32
    %44 = vector.broadcast %cst_18 : f32 to vector<8x1xf32>
    %45 = arith.select %43, %37, %44 : vector<8x1xi1>, vector<8x1xf32>
    %46 = vector.shape_cast %45 : vector<8x1xf32> to vector<1x8x1xf32>
    %cst_19 = arith.constant dense<0.000000e+00> : vector<1xf32>
    %47 = vector.multi_reduction <add>, %46, %cst_19 [1, 2] : vector<1x8x1xf32> to vector<1xf32>
    %48 = vector.shape_cast %47 : vector<1xf32> to vector<1x1x1xf32>
    %49 = vector.extract %48[0, 0, 0] : f32 from vector<1x1x1xf32>
    %c0_20 = arith.constant 0 : index
    %c0_21 = arith.constant 0 : index
    %50 = memref.load %arg7[%c0_20, %c0_21] : memref<1x1xf32, #tpu.memory_space<smem>>
    memref.store %49, %arg7[%c0_20, %c0_21] : memref<1x1xf32, #tpu.memory_space<smem>>
    return
  }
  func.func @transform_0(%arg0: i32) -> i32 {
    %c0_i32 = arith.constant 0 : i32
    %c0_i32_0 = arith.constant 0 : i32
    return %c0_i32 : i32
  }
  func.func @transform_1(%arg0: i32) -> (i32, i32) {
    %c0_i32 = arith.constant 0 : i32
    %c0_i32_0 = arith.constant 0 : i32
    return %arg0, %c0_i32 : i32, i32
  }
  func.func @transform_2(%arg0: i32) -> (i32, i32) {
    %c0_i32 = arith.constant 0 : i32
    %c0_i32_0 = arith.constant 0 : i32
    %c0_i32_1 = arith.constant 0 : i32
    return %c0_i32, %c0_i32_0 : i32, i32
  }
  func.func @transform_3(%arg0: i32) -> (i32, i32) {
    %c0_i32 = arith.constant 0 : i32
    %c0_i32_0 = arith.constant 0 : i32
    return %arg0, %c0_i32 : i32, i32
  }
  func.func @transform_4(%arg0: i32) -> (i32, i32) {
    %c0_i32 = arith.constant 0 : i32
    %c0_i32_0 = arith.constant 0 : i32
    return %arg0, %c0_i32 : i32, i32
  }
  func.func @transform_5(%arg0: i32) -> (i32, i32) {
    %c0_i32 = arith.constant 0 : i32
    %c0_i32_0 = arith.constant 0 : i32
    %c0_i32_1 = arith.constant 0 : i32
    return %c0_i32, %c0_i32_0 : i32, i32
  }
  func.func @transform_6(%arg0: i32) -> (i32, i32) {
    %c0_i32 = arith.constant 0 : i32
    %c0_i32_0 = arith.constant 0 : i32
    return %arg0, %c0_i32 : i32, i32
  }
}

</mosaic_0001>

<bundles_post_ra>
// kernel: tpu_custom_call.1
= control target key start
LH: loop header
LB: loop body
LE: loop exit
PB: predicated region body
PF: predicated region fallthrough
CT: control target
= control target key end

     0   :  { %11 = vsyncpa [#allocation5], 0  ;;  %s291_s0 = inlined_call_operand.vmem [shape: f32[2], index: 0, kind: input, shape index: {}]   ;;  %s292_s1 = inlined_call_operand.hbm [shape: f32[8,32], index: 1, kind: input, shape index: {}]   ;;  %s293_s2 = inlined_call_operand.vmem [shape: f32[1,10], index: 2, kind: input, shape index: {}]   ;;  %s294_s3 = inlined_call_operand.vmem [shape: s32[8,1], index: 3, kind: input, shape index: {}]   ;;  %s295_s4 = inlined_call_operand.vmem [shape: s32[8,1], index: 4, kind: input, shape index: {}]   ;;  %s296_s5 = inlined_call_operand.vmem [shape: f32[10,32], index: 5, kind: input, shape index: {}]   ;;  %s297_s6 = inlined_call_operand.hbm [shape: f32[1,1], index: 6, kind: output, shape index: {}]  }
   0x1   :  { %12 = vsyncpa [#allocation3], 0 }
   0x2   :  { %13 = vsyncpa [#allocation4], 0  ;;  %s19_s23 = sshll.u32 %s291_s0, 4  ;;  %s28_s26 = sshll.u32 %s292_s1, 4  ;;  %s20_s23 = int_to_ptr.vmem [resolvable:$true] %s19_s23  ;;  %s29_s26 = int_to_ptr.hbm [resolvable:$true] %s28_s26 }
   0x3   :  { %s228_s27 = smov [#allocation2]   ;;  %s229_s28 = smov [#allocation6]  }
   0x4   :  { %22 = dma.vmem_to_smem %s20_s23, 16, %s228_s27, [#allocation5]  }
   0x5   :  { %s30_s29 = sshll.u32 %s229_s28, 4  ;;  %s31_s29 = int_to_ptr.vmem [resolvable:$true] %s30_s29 }
   0x6   :  { %33 = dma.hbm_to_vmem [thread:$0]  %s29_s26, 128, %s31_s29, [#allocation3]  }
   0x7   :  { %222 = dma.done.wait [#allocation5], 16  }
   0x8   :  { %223 = vsyncadd [#allocation5], 4294967280 }
   0x9   :  { %224 = dma.done.wait [#allocation3], 128  }
   0xa   :  { %225 = vsyncadd [#allocation3], 4294967168 }
   0xb   :  { %50 = sfence }
   0xc   :  { %v55_v0 = vld [vmem:[%s296_s5 + $0x8] sm:$0x3]  ;;  %vm57_vm0 = vcmask 261120   ;;  %v53_v1 = vld [vmem:[#allocation6] sm:$0xff]  ;;  %v230_v3 = vmov 0   ;;  %s161_s12 = sld [smem:[#allocation2 + $0x1]]  ;;  %v97_v8 = vlaneseq }
   0xd   :  { %162 = vmatpush.xpose.msk.msra.mxu0 %vm57_vm0, %v55_v0  ;;  %v56_v2 = vmul.f32 %v53_v1, %v53_v1  ;;  %172 = vset.pattern.permute.xlu1 %v230_v3  ;;  %v104_v4 = vld [vmem:[%s295_s4] sm:$0xff]  ;;  %vm117_vm3 = vcmask 80896   ;;  %vm131_vm4 = vcmask 7168   ;;  %s149_s15 = sshll.u32 %s297_s6, 4  ;;  %s231_s17 = smov [#allocation7]   ;;  %s150_s15 = int_to_ptr.hbm [resolvable:$true] %s149_s15 }
   0xe   :  { %v54_v5 = vld [vmem:[%s296_s5] sm:$0xff]  ;;  %171 = vset.pattern.permute.xlu0 %v230_v3  ;;  %106 = vperm.xlu1 %172, %v104_v4   ;;  %v98_v12 = vand.u32 127, %v97_v8 }
   0xf   :  { %v58_v6 = vsel %vm57_vm0, %v56_v2, 0.0  ;;  %v99_v7 = vld [vmem:[%s294_s3] sm:$0xff] }
  0x10   :  { %59 = vadd.xlane.f32.xlu0 %v58_v6  ;;  %v173_v9 = vld [vmem:[%s293_s2] ss:$0 sm:$0xff]  ;;  %s51_s2 = sld [smem:[#allocation2]] }
  0x11   :  { %163 = vmatpush.xpose.msk.msra.mxu0 %vm57_vm0, %v54_v5 }
  0x12   :  { %s112_s4 = ssub.f32 1.0, %s161_s12  ;;  %v109_v17 = vstv %s161_s12 }
  0x14   :  { %164 = vmatmul.msk.f32.vlgmr.msra.gmra.mxu0 %vm57_vm0, %v53_v1  ;;  %v113_v16 = vstv %s112_s4 }
  0x16   :  { %v121_v26 = vstv %s51_s2 }
  0x24   :  { %101 = vperm.xlu0 %171, %v99_v7  }
  0x80   :  { %v107_v15 = vpop.permute.xlu1 %106 }
  0x81   :  { %vm108_vm1 = vcmp.eq.s32.totalorder %v107_v15, %v98_v12 }
  0x83   :  { %v60_v10 = vpop.xlane.xlu0 %59 }
  0x84   :  { %v94_v13 = vadd.f32 %v173_v9, %v60_v10 }
  0x91   :  { %v87_v11 = vpop.f32.mrf.mxu0 }
  0x92   :  { %v95_v14 = vmul.f32 2.0, %v87_v11 }
  0x94   :  { %v96_v18 = vsub.f32 %v94_v13, %v95_v14 }
  0x96   :  { %v114_v19 = vmul.f32 %v113_v16, %v96_v18  ;;  %v102_v20 = vpop.permute.xlu0 %101  ;;  %v110_v21 = vmul.f32 %v109_v17, %v96_v18 }
  0x97   :  { %vm103_vm2 = vcmp.eq.s32.totalorder %v102_v20, %v98_v12 }
  0x98   :  { %v115_v22 = vsel %vm108_vm1, %v114_v19, 0.0  ;;  %v111_v23 = vsel %vm103_vm2, %v110_v21, 0.0 }
  0x99   :  { %v116_v24 = vsub.f32 %v111_v23, %v115_v22 }
  0x9b   :  { %v118_v25 = vsel %vm117_vm3, %v116_v24, 0.0 }
  0x9c   :  { %119 = vadd.xlane.f32.xlu1 %v118_v25 }
 0x10f   :  { %v120_v27 = vpop.xlane.xlu1 %119 }
 0x110   :  { %v122_v28 = vadd.f32 %v121_v26, %v120_v27 }
 0x112   :  { %v123_v29 = vmax.f32 %v122_v28, 0.0 }
 0x114   :  { %v132_v30 = vsel %vm131_vm4, %v123_v29, 0.0 }
 0x115   :  { %133 = vadd.xlane.f32.xlu2 %v132_v30 }
 0x188   :  { %v134_v31 = vpop.xlane.xlu2 %133 }
 0x189   :  { %v135_v32 = vrot.slane %v134_v31, 4 }
 0x18b   :  { %v136_v33 = vadd.f32 %v135_v32, %v134_v31 }
 0x18d   :  { %v137_v34 = vrot.slane %v136_v33, 2 }
 0x18f   :  { %v138_v35 = vadd.f32 %v137_v34, %v136_v33 }
 0x191   :  { %v139_v36 = vrot.slane %v138_v35, 1 }
 0x193   :  { %v140_v37 = vadd.f32 %v139_v36, %v138_v35 }
 0x195   :  { %165 = vpush %v140_v37 }
 0x1c6   :  { %s166_s16 = spop %165 }
 0x1c7   :  { %143 = sst [smem:[#allocation7]] %s166_s16 }
 0x1c8   :  { %152 = dma.smem_to_hbm %s231_s17, 16, %s150_s15, [#allocation4]  }
 0x1c9   :  { %226 = dma.done.wait [#allocation4], 16  }
 0x1ca   :  { %227 = vsyncadd [#allocation4], 4294967280 }
 0x1cb   :  { %157 = sfence }
 0x1cc   :  { %158 = vsyncpa [#allocation3], 1 }
 0x1cd   :  { %159 = vsyncpa [#allocation4], 1 }
 0x1ce   :  { %160 = vsyncpa [#allocation5], 1 }

</bundles_post_ra>
